<compile_context>
chip_gen: v5e
topology: v5e:2x2
jax: 0.10.0
libtpu: 0.0.40
codegen_flags: <defaults>
</compile_context>

<pallas_src>
import functools

import jax
import jax.numpy as jnp
from jax import lax
from jax.experimental import pallas as pl
from jax.experimental.pallas import tpu as pltpu


def _round_up(v, m):
    return -(-v // m) * m


# --------------------- kernel 1: h = x @ W^T + b (row-tiled) ------------------

def _linear_bias_kernel(x_ref, w_ref, b_ref, h_ref, *, n, tr, mask_rows,
                        compute_dtype):
    xb = x_ref[...].astype(compute_dtype)
    h = jnp.dot(xb, w_ref[...], preferred_element_type=jnp.float32)
    h = h + b_ref[...]                       # f32 bias add
    if mask_rows:
        # Rows >= n come from out-of-bounds x reads (garbage, possibly NaN):
        # force them to exact zeros so kernel 2's contraction stays finite.
        row = lax.broadcasted_iota(jnp.int32, h.shape, 0) + pl.program_id(0) * tr
        h = jnp.where(row < n, h, 0.0)
    h_ref[...] = h.astype(h_ref.dtype)


# ------------- kernel 2: y = adj @ h (rows x contraction, f32 acc) ------------

def _aggregate_kernel(adj_ref, h_ref, o_ref, *, n, tk, mask_k, compute_dtype):
    k = pl.program_id(1)

    @pl.when(k == 0)
    def _():
        o_ref[...] = jnp.zeros_like(o_ref)   # resident f32 output block

    a = adj_ref[...]
    if mask_k:
        # Last k tile overhangs adj's N columns; OOB reads are garbage
        # (possibly NaN) -> select them to exact zeros before the MXU.
        col = lax.broadcasted_iota(jnp.int32, a.shape, 1) + k * tk
        a = jnp.where(col < n, a, 0)
    a = a.astype(compute_dtype)              # in-kernel cast (hidden under DMA)

    if h_ref.shape[0] != tk:                 # h fully VMEM-resident: slice it
        start = pl.multiple_of(k * tk, 128)  # tk is a multiple of 128 here
        h_blk = h_ref[pl.ds(start, tk), :]
    else:                                    # per-k-tile streamed h block
        h_blk = h_ref[...]

    o_ref[...] += jnp.dot(a, h_blk, preferred_element_type=jnp.float32)


# --------------------------------- wrapper ------------------------------------

def _pick_tiles(n, f_out_p, block_m, block_k, f_in, x_itemsize):
    # Contraction / adj-lane tile: multiple of 128, or the full dim if small.
    tk = block_k if n > block_k else n

    # Output-row tile: try to give the megacore 'parallel' row axis >= 2 tiles.
    if n > block_m:
        tm = block_m
    else:
        half = _round_up(-(-n // 2), 128)
        tm = half if half < n else n
    # Cap the resident f32 output block (tm x f_out_p) so large F_out still
    # fits v7x's smaller VMEM alongside double-buffered adj tiles.
    cap = max(128, ((4 << 20) // (4 * f_out_p)) // 128 * 128)
    if tm > cap:
        tm = cap

    # Kernel-1 row tile: divide tk down (keeping sublane alignment and exact
    # divisibility of the padded h rows) so the (tr, f_in) x tile stays modest.
    tr = tk
    while tr > 512 and tr % 16 == 0:
        tr //= 2
    while tr > 8 and tr % 16 == 0 and tr * f_in * x_itemsize > (4 << 20):
        tr //= 2
    return tm, tk, tr


def graph_convolution(x, adj, weight, bias, *, block_m=1024, block_k=1024,
                      compute_dtype=jnp.bfloat16):
    """GCN layer: y = adj @ (x @ weight.T + bias).

    x: (N, F_in), adj: (N, N), weight: (F_out, F_in) [torch nn.Linear layout],
    bias: (F_out,).  Returns (N, F_out) in x.dtype.

    adj and x are streamed as-is (no padded copies); casts to `compute_dtype`
    happen inside the kernels with f32 accumulation.  Pass adj already in
    `compute_dtype` to halve its HBM stream across many layers.
    """
    n, f_in = x.shape
    assert adj.shape == (n, n)
    f_out, f_in_w = weight.shape
    assert f_in_w == f_in
    out_dtype = x.dtype
    compute_dtype = jnp.dtype(compute_dtype)

    block_m = _round_up(max(block_m, 128), 128)
    block_k = _round_up(max(block_k, 128), 128)

    # Lane-dense internal output width (full-width vector stores).
    f_out_p = _round_up(max(f_out, 128), 128)

    tm, tk, tr = _pick_tiles(n, f_out_p, block_m, block_k, f_in,
                             jnp.dtype(x.dtype).itemsize)
    n_k = _round_up(n, tk)            # h rows, padded to the contraction tile
    mask_k = (n % tk) != 0
    mask_rows = (n_k != n)

    # Tiny packed weight / bias (F_out padded to f_out_p; zero pad -> exact).
    w_p = jnp.zeros((f_in, f_out_p), compute_dtype).at[:, :f_out].set(
        weight.T.astype(compute_dtype))
    b_p = jnp.zeros((1, f_out_p), jnp.float32).at[0, :f_out].set(
        bias.astype(jnp.float32))

    # ---- kernel 1: h = x @ W^T + b, computed once; padded rows are zeros ----
    last_xblk = max(0, pl.cdiv(n, tr) - 1)    # clamp fully-padded row tiles
    lin_kernel = functools.partial(_linear_bias_kernel, n=n, tr=tr,
                                   mask_rows=mask_rows,
                                   compute_dtype=compute_dtype)
    h = pl.pallas_call(
        lin_kernel,
        out_shape=jax.ShapeDtypeStruct((n_k, f_out_p), compute_dtype),
        grid=(n_k // tr,),
        in_specs=[
            pl.BlockSpec((tr, f_in), lambda i: (jnp.minimum(i, last_xblk), 0)),
            pl.BlockSpec((f_in, f_out_p), lambda i: (0, 0)),
            pl.BlockSpec((1, f_out_p), lambda i: (0, 0)),
        ],
        out_specs=pl.BlockSpec((tr, f_out_p), lambda i: (i, 0)),
        compiler_params=pltpu.CompilerParams(
            dimension_semantics=("parallel",),
            vmem_limit_bytes=32 * 1024 * 1024),
    )(x, w_p, b_p)

    # ---- kernel 2: y = adj @ h; adj streamed unpadded, reduction axis last ----
    h_resident = (n_k * f_out_p * compute_dtype.itemsize) <= (2 << 20)
    if h_resident:
        h_spec = pl.BlockSpec((n_k, f_out_p), lambda i, k: (0, 0))   # fetch once
    else:
        h_spec = pl.BlockSpec((tk, f_out_p), lambda i, k: (k, 0))

    agg_kernel = functools.partial(_aggregate_kernel, n=n, tk=tk, mask_k=mask_k,
                                   compute_dtype=compute_dtype)
    y_p = pl.pallas_call(
        agg_kernel,
        out_shape=jax.ShapeDtypeStruct((n, f_out_p), jnp.float32),
        grid=(pl.cdiv(n, tm), pl.cdiv(n, tk)),
        in_specs=[
            pl.BlockSpec((tm, tk), lambda i, k: (i, k)),
            h_spec,
        ],
        out_specs=pl.BlockSpec((tm, f_out_p), lambda i, k: (i, 0)),
        compiler_params=pltpu.CompilerParams(
            dimension_semantics=("parallel", "arbitrary"),
            vmem_limit_bytes=32 * 1024 * 1024),
    )(adj, h)

    # TODO(synk): for sparse adjacency, scalar-prefetch per-row-tile lists of
    # nonzero k tiles (PrefetchScalarGridSpec) and skip all-zero adj tiles.
    # TODO(synk): int8 adj (v5e/v6e) or fp8 adj (v7x) with per-row scales would
    # further halve/quarter the adj HBM stream of the bandwidth-bound kernel 2.
    # TODO(synk): add an F_out grid axis for very large output dims (>2k).
    return y_p[:, :f_out].astype(out_dtype)


if __name__ == "__main__":
    key = jax.random.PRNGKey(0)

    # ---- test 1: small shapes consistent with the module's forward ----
    N, F_IN, F_OUT = 8, 32, 16
    kx, kadj, kw, kb = jax.random.split(key, 4)
    x = jax.random.normal(kx, (N, F_IN), dtype=jnp.float32)
    adj = jax.random.uniform(kadj, (N, N), dtype=jnp.float32)
    bound = 1.0 / (F_IN ** 0.5)
    weight = jax.random.uniform(kw, (F_OUT, F_IN), jnp.float32, -bound, bound)
    bias = jax.random.uniform(kb, (F_OUT,), jnp.float32, -bound, bound)

    y_ref = adj @ (x @ weight.T + bias)

    y_f32 = graph_convolution(x, adj, weight, bias, compute_dtype=jnp.float32)
    jax.block_until_ready(y_f32)
    assert y_f32.shape == (N, F_OUT)
    assert jnp.allclose(y_f32, y_ref, atol=1e-4, rtol=1e-4)

    y_bf16 = graph_convolution(x, adj, weight, bias)   # bf16 compute default
    jax.block_until_ready(y_bf16)
    assert y_bf16.shape == (N, F_OUT)
    assert jnp.allclose(y_bf16, y_ref, atol=1e-1, rtol=5e-2)

    # ---- test 2: non-tile-aligned N exercising the ragged/masking paths ----
    N2, F_IN2, F_OUT2 = 300, 48, 20
    k2 = jax.random.split(jax.random.PRNGKey(1), 4)
    x2 = jax.random.normal(k2[0], (N2, F_IN2), dtype=jnp.float32)
    adj2 = jax.random.uniform(k2[1], (N2, N2), dtype=jnp.float32)
    bound2 = 1.0 / (F_IN2 ** 0.5)
    w2 = jax.random.uniform(k2[2], (F_OUT2, F_IN2), jnp.float32, -bound2, bound2)
    b2 = jax.random.uniform(k2[3], (F_OUT2,), jnp.float32, -bound2, bound2)
    y2_ref = adj2 @ (x2 @ w2.T + b2)

    # Default tiles (single k tile, no masking) vs forced small tiles
    # (ragged k tile -> in-kernel masking, padded h rows) must agree tightly.
    y2_a = graph_convolution(x2, adj2, w2, b2, compute_dtype=jnp.float32)
    y2_b = graph_convolution(x2, adj2, w2, b2, compute_dtype=jnp.float32,
                             block_m=256, block_k=128)
    jax.block_until_ready((y2_a, y2_b))
    assert y2_a.shape == (N2, F_OUT2) and y2_b.shape == (N2, F_OUT2)
    assert jnp.allclose(y2_a, y2_b, atol=5e-3, rtol=1e-3)
    assert jnp.allclose(y2_a, y2_ref, atol=5e-2, rtol=5e-2)

    print("KERNEL_OK")
</pallas_src>

<mosaic_0001>
module attributes {stable_mosaic.version = 11 : i64} {
  func.func @_linear_bias_kernel(%arg0: i32, %arg1: memref<8x32xf32, #tpu.memory_space<vmem>>, %arg2: memref<32x128xf32, #tpu.memory_space<vmem>>, %arg3: memref<1x128xf32, #tpu.memory_space<vmem>>, %arg4: memref<8x128xf32, #tpu.memory_space<vmem>>) attributes {dimension_semantics = [#tpu.dimension_semantics<parallel>], iteration_bounds = array<i64: 1>, scalar_prefetch = 0 : i64, scratch_operands = 0 : i64, tpu.core_type = #tpu.core_type<tc>, window_params = [{transform_indices = @transform_0, window_bounds = array<i64: 8, 32>}, {pipeline_mode = #tpu.pipeline_mode<synchronous>, transform_indices = @transform_1, window_bounds = array<i64: 32, 128>}, {pipeline_mode = #tpu.pipeline_mode<synchronous>, transform_indices = @transform_2, window_bounds = array<i64: 1, 128>}, {transform_indices = @transform_3, window_bounds = array<i64: 8, 128>}]} {
    %c0 = arith.constant 0 : index
    %c0_0 = arith.constant 0 : index
    %0 = vector.load %arg1[%c0, %c0_0] : memref<8x32xf32, #tpu.memory_space<vmem>>, vector<8x32xf32>
    %c0_1 = arith.constant 0 : index
    %c0_2 = arith.constant 0 : index
    %1 = vector.load %arg2[%c0_1, %c0_2] : memref<32x128xf32, #tpu.memory_space<vmem>>, vector<32x128xf32>
    %cst = arith.constant dense<0.000000e+00> : vector<8x128xf32>
    %2 = tpu.matmul %0, %1, %cst {dimension_numbers = #tpu.dot_dimension_numbers<[1], [0], [0], [1], [0, 0, 1, 1], [], []>} : vector<8x32xf32>, vector<32x128xf32>, vector<8x128xf32> -> vector<8x128xf32>
    %c0_3 = arith.constant 0 : index
    %c0_4 = arith.constant 0 : index
    %3 = vector.load %arg3[%c0_3, %c0_4] : memref<1x128xf32, #tpu.memory_space<vmem>>, vector<1x128xf32>
    %4 = vector.broadcast %3 : vector<1x128xf32> to vector<8x128xf32>
    %5 = arith.addf %2, %4 : vector<8x128xf32>
    %c0_5 = arith.constant 0 : index
    %c0_6 = arith.constant 0 : index
    %6 = vector.load %arg4[%c0_5, %c0_6] : memref<8x128xf32, #tpu.memory_space<vmem>>, vector<8x128xf32>
    tpu.vector_store %arg4[%c0_5, %c0_6], %5 {strides = array<i32>} : memref<8x128xf32, #tpu.memory_space<vmem>>, vector<8x128xf32>,
    return
  }
  func.func @transform_0(%arg0: i32) -> (i32, i32) {
    %c0_i32 = arith.constant 0 : i32
    %0 = arith.minsi %arg0, %c0_i32 : i32
    %c0_i32_0 = arith.constant 0 : i32
    %c0_i32_1 = arith.constant 0 : i32
    return %0, %c0_i32_0 : i32, i32
  }
  func.func @transform_1(%arg0: i32) -> (i32, i32) {
    %c0_i32 = arith.constant 0 : i32
    %c0_i32_0 = arith.constant 0 : i32
    %c0_i32_1 = arith.constant 0 : i32
    return %c0_i32, %c0_i32_0 : i32, i32
  }
  func.func @transform_2(%arg0: i32) -> (i32, i32) {
    %c0_i32 = arith.constant 0 : i32
    %c0_i32_0 = arith.constant 0 : i32
    %c0_i32_1 = arith.constant 0 : i32
    return %c0_i32, %c0_i32_0 : i32, i32
  }
  func.func @transform_3(%arg0: i32) -> (i32, i32) {
    %c0_i32 = arith.constant 0 : i32
    %c0_i32_0 = arith.constant 0 : i32
    return %arg0, %c0_i32 : i32, i32
  }
}

</mosaic_0001>

<bundles_post_ra>
// kernel: tpu_custom_call.1
= control target key start
LH: loop header
LB: loop body
LE: loop exit
PB: predicated region body
PF: predicated region fallthrough
CT: control target
= control target key end

     0   :  { %8 = vsyncpa [#allocation3], 0  ;;  %s219_s0 = inlined_call_operand.hbm [shape: f32[8,32], index: 0, kind: input, shape index: {}]   ;;  %s220_s1 = inlined_call_operand.hbm [shape: f32[32,128], index: 1, kind: input, shape index: {}]   ;;  %s221_s2 = inlined_call_operand.vmem [shape: f32[1,128], index: 2, kind: input, shape index: {}]   ;;  %s222_s3 = inlined_call_operand.hbm [shape: f32[8,128], index: 3, kind: output, shape index: {}]  }
   0x1   :  { %9 = vsyncpa [#allocation6], 0 }
   0x2   :  { %10 = vsyncpa [#allocation4], 0  ;;  %s16_s14 = sshll.u32 %s219_s0, 4  ;;  %s182_s15 = smov [#allocation2]   ;;  %s17_s14 = int_to_ptr.hbm [resolvable:$true] %s16_s14 }
   0x3   :  { %s18_s16 = sshll.u32 %s182_s15, 4  ;;  %s26_s19 = sshll.u32 %s220_s1, 4  ;;  %s19_s16 = int_to_ptr.vmem [resolvable:$true] %s18_s16  ;;  %s27_s19 = int_to_ptr.hbm [resolvable:$true] %s26_s19 }
   0x4   :  { %21 = dma.hbm_to_vmem [thread:$0]  %s17_s14, 128, %s19_s16, [#allocation3]  }
   0x5   :  { %s183_s20 = smov [#allocation5]   ;;  %s184_s22 = smov 128  }
   0x6   :  { %s28_s21 = sshll.u32 %s183_s20, 4  ;;  %s185_s23 = smov 8   ;;  %s29_s21 = int_to_ptr.vmem [resolvable:$true] %s28_s21 }
   0x7   :  { %34 = dma.hbm_to_vmem [thread:$0]  %s27_s19, 512, %s29_s21, [#allocation6], %s184_s22, %s184_s22, %s185_s23  }
   0x8   :  { %176 = dma.done.wait [#allocation3], 128  }
   0x9   :  { %177 = vsyncadd [#allocation3], 4294967168 }
   0xa   :  { %178 = dma.done.wait [#allocation6], 512  }
   0xb   :  { %179 = vsyncadd [#allocation6], 4294966784  ;;  %v49_v0 = vld [vmem:[#allocation5 + $0x18] sm:$0xff]  ;;  %v48_v1 = vld [vmem:[#allocation5 + $0x10] sm:$0xff]  ;;  %vm54_vm0 = vcmask 261120   ;;  %s186_s24 = smov [#allocation7]  }
   0xc   :  { %70 = vmatpush.msra.mxu0 %v49_v0  ;;  %v47_v2 = vld [vmem:[#allocation5 + $0x8] sm:$0xff]  ;;  %v46_v3 = vld [vmem:[#allocation5] sm:$0xff]  ;;  %v45_v4 = vld [vmem:[#allocation2] sm:$0xff]  ;;  %s84_s25 = sshll.u32 %s186_s24, 4  ;;  %s86_s28 = sshll.u32 %s222_s3, 4  ;;  %s85_s25 = int_to_ptr.vmem [resolvable:$true] %s84_s25  ;;  %s87_s28 = int_to_ptr.hbm [resolvable:$true] %s86_s28 }
   0xd   :  { %v103_v5 = vld [vmem:[%s221_s2] ss:$0 sm:$0xff] }
   0xe   :  { %71 = vmatpush.msra.mxu0 %v48_v1 }
  0x10   :  { %72 = vmatpush.msra.mxu0 %v47_v2 }
  0x12   :  { %73 = vmatpush.msra.mxu0 %v46_v3 }
  0x13   :  { %97 = vmatmul.msk.f32.vlgmr.msra.gmra.mxu0 %vm54_vm0, %v45_v4 }
  0x90   :  { %v75_v6 = vpop.f32.mrf.mxu0 }
  0x91   :  { %v76_v7 = vadd.f32 %v103_v5, %v75_v6 }
  0x93   :  { %78 = vst [vmem:[#allocation7] sm:$0xff] %v76_v7 }
  0x94   :  { %89 = dma.vmem_to_hbm [thread:$0]  %s85_s25, 128, %s87_s28, [#allocation4]  }
  0x95   :  { %180 = dma.done.wait [#allocation4], 128  }
  0x96   :  { %181 = vsyncadd [#allocation4], 4294967168 }
  0x97   :  { %94 = vsyncpa [#allocation3], 1 }
  0x98   :  { %95 = vsyncpa [#allocation6], 1 }
  0x99   :  { %96 = vsyncpa [#allocation4], 1 }

</bundles_post_ra>
